<compile_context>
chip_gen: v7x
topology: tpu7x:2x2x1
jax: 0.10.0
libtpu: 0.0.40
codegen_flags: <defaults>
</compile_context>

<pallas_src>
import functools

import jax
import jax.numpy as jnp
from jax.experimental import pallas as pl
from jax.experimental.pallas import tpu as pltpu


_EPS = 1e-12  # matches torch.nn.functional.normalize default eps


# ----------------------------------------------------------------------------
# Helpers
# ----------------------------------------------------------------------------
def _round_up(x, m):
    return ((x + m - 1) // m) * m


def _cdiv(a, b):
    return -(-a // b)


def _vmem_capacity_bytes():
    try:
        info = pltpu.get_tpu_info()
        cap = getattr(info, "vmem_capacity_bytes", None)
        if cap:
            return int(cap)
    except Exception:
        pass
    return 64 * 1024 * 1024  # conservative default (v7x per-core VMEM)


def _choose_tiling(n, d, max_rows_per_tile=None):
    """Divisor-aware row tiling.  Returns (tn, num_tiles, n_pad, vmem_limit)."""
    cap = _vmem_capacity_bytes()
    d_eff = _round_up(d, 128)          # lane-padded width of f32 temporaries
    row2_eff = _round_up(2 * d, 128)   # lane-padded width of gathered (e||t) rows
    # Per-row VMEM footprint: 3 gather buffers + ~8 live f32 temporaries the
    # traced body keeps around (normalized e's, raw t's, projections, diff).
    bytes_per_row = 3 * row2_eff * 4 + 8 * d_eff * 4
    budget = max(4 << 20, int(0.40 * cap))
    tn_max = budget // bytes_per_row
    tn_max = max(128, min(2048, (tn_max // 128) * 128))
    if max_rows_per_tile is not None:
        tn_max = max(128, min(tn_max, (int(max_rows_per_tile) // 128) * 128))

    n = max(int(n), 1)
    if _round_up(n, 8) <= tn_max:
        # Single full-extent tile (output block == full slab, so tn only needs
        # sublane alignment).
        tn = _round_up(n, 8)
        num_tiles = 1
    else:
        n_ceil = _round_up(n, 128)
        num_tiles = _cdiv(n_ceil, tn_max)
        tn = _round_up(_cdiv(n, num_tiles), 128)   # waste < 128 rows per tile
    n_pad = num_tiles * tn

    usage = 3 * tn * row2_eff * 4 + 8 * tn * d_eff * 4
    vmem_limit = min(int(0.9 * cap), max(32 << 20, usage + (16 << 20)))
    return tn, num_tiles, n_pad, int(vmem_limit)


# ----------------------------------------------------------------------------
# Pallas kernel
# ----------------------------------------------------------------------------
def _transd_kernel(
    hidx_ref, tidx_ref, ridx_ref,   # SMEM scalar-prefetch index vectors (n_pad,)
    ent_hbm, rel_hbm,               # HBM tables (memory_space=pl.ANY), (n, 2D)
    o_ref,                          # (1, tn) lane-dense scores
    hbuf, tbuf, rbuf,               # (tn, 2D) VMEM gather scratch
    sems,                           # DMA semaphores (3,)
    *, d, tn, p,
):
    i = pl.program_id(0)
    base = i * tn

    def row_copy(table, row, buf, slot, sem):
        return pltpu.make_async_copy(
            table.at[pl.ds(row, 1), :],
            buf.at[pl.ds(slot, 1), :],
            sem,
        )

    # Fused gather: one DMA per (row, stream) straight from the HBM tables into
    # VMEM scratch -- no (N, D) intermediates ever touch HBM.
    @pl.loop(0, tn)
    def _issue(r):
        row_copy(ent_hbm, hidx_ref[base + r], hbuf, r, sems.at[0]).start()
        row_copy(ent_hbm, tidx_ref[base + r], tbuf, r, sems.at[1]).start()
        row_copy(rel_hbm, ridx_ref[base + r], rbuf, r, sems.at[2]).start()

    # Drain: per-row waits with shape-matched descriptors (correct regardless
    # of whether the DMA semaphore counts bytes or completions).
    @pl.loop(0, tn)
    def _drain(r):
        row_copy(ent_hbm, 0, hbuf, 0, sems.at[0]).wait()
        row_copy(ent_hbm, 0, tbuf, 0, sems.at[1]).wait()
        row_copy(rel_hbm, 0, rbuf, 0, sems.at[2]).wait()

    eps_sq = jnp.float32(_EPS * _EPS)

    def l2_normalize(x):
        # x / max(||x||, eps)  ==  x * rsqrt(max(sum_sq, eps^2))   (EUP rsqrt)
        ssq = jnp.sum(x * x, axis=-1, keepdims=True)
        return x * jax.lax.rsqrt(jnp.maximum(ssq, eps_sq))

    ha = hbuf[...].astype(jnp.float32)   # (tn, 2D): ent_embed || proj_ent_embed
    ta = tbuf[...].astype(jnp.float32)
    ra = rbuf[...].astype(jnp.float32)   # (tn, 2D): rel_embed || proj_rel_embed

    head_e, head_t = l2_normalize(ha[:, :d]), ha[:, d:]
    tail_e, tail_t = l2_normalize(ta[:, :d]), ta[:, d:]
    rela_e, rela_t = l2_normalize(ra[:, :d]), ra[:, d:]

    # _transfer(e, t, r) = normalize(e + sum(e*t, -1, keepdims) * r)
    head_proj = l2_normalize(
        head_e + jnp.sum(head_e * head_t, axis=-1, keepdims=True) * rela_t)
    tail_proj = l2_normalize(
        tail_e + jnp.sum(tail_e * tail_t, axis=-1, keepdims=True) * rela_t)

    diff = tail_proj - head_proj - rela_e   # (tn, d) f32

    # Row-wise p-norm produced lane-major (1, tn) via an MXU contraction
    # ones(1, d) . X^T.  The MXU rounds f32 operands to bf16 at DEFAULT
    # precision, so split into bf16 hi + residual lo and sum both passes:
    # near-exact f32 on an otherwise-idle MXU (Precision.HIGHEST equivalent).
    ones_row = jnp.ones((1, d), jnp.float32)

    def mxu_row_sum(m):
        return jax.lax.dot_general(
            ones_row, m,
            dimension_numbers=(((1,), (1,)), ((), ())),
            preferred_element_type=jnp.float32)

    def sum_rows_lane_major(x):
        x_hi = x.astype(jnp.bfloat16).astype(jnp.float32)
        x_lo = x - x_hi
        return mxu_row_sum(x_hi) + mxu_row_sum(x_lo)

    if p == 1:
        score = sum_rows_lane_major(jnp.abs(diff))
    elif p == 2:
        score = jnp.sqrt(sum_rows_lane_major(diff * diff))
    else:
        pf = jnp.float32(p)
        score = jnp.power(sum_rows_lane_major(jnp.power(jnp.abs(diff), pf)),
                          1.0 / pf)

    o_ref[...] = score   # (1, tn), lane dense


# ----------------------------------------------------------------------------
# Wrapper (parameters + pallas_call); gathers are fused into the kernel.
# ----------------------------------------------------------------------------
class TransD:
    """JAX/Pallas port of NSCaching's TransDModule forward pass."""

    def __init__(self, n_ent, n_rel, hidden_dim, p=1, key=None):
        self.p = p
        self.hidden_dim = hidden_dim
        key = jax.random.PRNGKey(0) if key is None else key
        k1, k2, k3, k4 = jax.random.split(key, 4)

        def xavier_uniform(k, shape):
            fan_in, fan_out = shape[1], shape[0]   # nn.Embedding weight (num, dim)
            bound = (6.0 / (fan_in + fan_out)) ** 0.5
            return jax.random.uniform(k, shape, minval=-bound, maxval=bound,
                                      dtype=jnp.float32)

        rel_embed = xavier_uniform(k1, (n_rel, hidden_dim))
        ent_embed = xavier_uniform(k2, (n_ent, hidden_dim))
        proj_rel_embed = xavier_uniform(k3, (n_rel, hidden_dim))
        proj_ent_embed = xavier_uniform(k4, (n_ent, hidden_dim))

        # Feature-axis concatenation: one (2D,) row DMA per index instead of
        # two (D,) gathers -> half the gather descriptors.
        self.ent_all = jnp.concatenate([ent_embed, proj_ent_embed], axis=1)
        self.rel_all = jnp.concatenate([rel_embed, proj_rel_embed], axis=1)

    def forward(self, head, tail, rela, max_rows_per_tile=None):
        shape = head.shape
        head = head.reshape(-1).astype(jnp.int32)
        tail = tail.reshape(-1).astype(jnp.int32)
        rela = rela.reshape(-1).astype(jnp.int32)
        n = head.shape[0]
        d = self.hidden_dim

        tn, num_tiles, n_pad, vmem_limit = _choose_tiling(n, d, max_rows_per_tile)

        pad = n_pad - n
        if pad:
            # Pad the index vectors (index 0 is a valid row); padded scores are
            # dropped below.  Waste is bounded to <128 rows per tile.
            zpad = jnp.zeros((pad,), jnp.int32)
            head = jnp.concatenate([head, zpad])
            tail = jnp.concatenate([tail, zpad])
            rela = jnp.concatenate([rela, zpad])

        kernel = functools.partial(_transd_kernel, d=d, tn=tn, p=self.p)

        scores = pl.pallas_call(
            kernel,
            out_shape=jax.ShapeDtypeStruct((1, n_pad), jnp.float32),
            grid_spec=pltpu.PrefetchScalarGridSpec(
                num_scalar_prefetch=3,                    # head/tail/rela -> SMEM
                grid=(num_tiles,),
                in_specs=[
                    pl.BlockSpec(memory_space=pl.ANY),    # ent||proj_ent table (HBM)
                    pl.BlockSpec(memory_space=pl.ANY),    # rel||proj_rel table (HBM)
                ],
                out_specs=pl.BlockSpec((1, tn), lambda i, *_: (0, i)),
                scratch_shapes=[
                    pltpu.VMEM((tn, 2 * d), jnp.float32),   # gathered head rows
                    pltpu.VMEM((tn, 2 * d), jnp.float32),   # gathered tail rows
                    pltpu.VMEM((tn, 2 * d), jnp.float32),   # gathered rela rows
                    pltpu.SemaphoreType.DMA((3,)),
                ],
            ),
            compiler_params=pltpu.CompilerParams(
                # Each grid step is self-contained (gather + compute + store),
                # so the row-tile axis is order-independent / core-shardable.
                dimension_semantics=("parallel",),
                vmem_limit_bytes=vmem_limit,
            ),
        )(head, tail, rela, self.ent_all, self.rel_all)

        return scores.reshape(n_pad)[:n].reshape(shape)

    __call__ = forward


# ----------------------------------------------------------------------------
# Pure-JAX reference (mirrors the PyTorch module) for verification.
# ----------------------------------------------------------------------------
def _reference_forward(model, head, tail, rela):
    d = model.hidden_dim
    shape = head.shape
    h = head.reshape(-1)
    t = tail.reshape(-1)
    r = rela.reshape(-1)

    def l2n(x):
        nrm = jnp.sqrt(jnp.sum(x * x, -1, keepdims=True))
        return x / jnp.maximum(nrm, _EPS)

    ha = jnp.take(model.ent_all, h, axis=0).astype(jnp.float32)
    ta = jnp.take(model.ent_all, t, axis=0).astype(jnp.float32)
    ra = jnp.take(model.rel_all, r, axis=0).astype(jnp.float32)
    head_e, head_t = l2n(ha[:, :d]), ha[:, d:]
    tail_e, tail_t = l2n(ta[:, :d]), ta[:, d:]
    rela_e, rela_t = l2n(ra[:, :d]), ra[:, d:]

    def transfer(e, tt, rr):
        return l2n(e + jnp.sum(e * tt, -1, keepdims=True) * rr)

    diff = transfer(tail_e, tail_t, rela_t) - transfer(head_e, head_t, rela_t) - rela_e
    if model.p == 1:
        s = jnp.sum(jnp.abs(diff), -1)
    elif model.p == 2:
        s = jnp.sqrt(jnp.sum(diff * diff, -1))
    else:
        s = jnp.sum(jnp.abs(diff) ** model.p, -1) ** (1.0 / model.p)
    return s.reshape(shape)


if __name__ == "__main__":
    n_ent, n_rel, hidden_dim = 32, 8, 32

    key = jax.random.PRNGKey(0)
    k_params, k_h, k_t, k_r = jax.random.split(key, 4)

    def make_idx(k, shp, hi):
        return jax.random.randint(k, shp, 0, hi, dtype=jnp.int32)

    checks = []

    # 1) small batch, p=1 (single full-extent tile).
    m1 = TransD(n_ent, n_rel, hidden_dim, p=1, key=k_params)
    h1 = make_idx(k_h, (2, 4), n_ent)
    t1 = make_idx(k_t, (2, 4), n_ent)
    r1 = make_idx(k_r, (2, 4), n_rel)
    checks.append((jax.block_until_ready(m1.forward(h1, t1, r1)),
                   _reference_forward(m1, h1, t1, r1), h1.shape))

    # 2) N not a multiple of 8, p=2 (index padding + L2 branch).
    m2 = TransD(n_ent, n_rel, hidden_dim, p=2, key=k_params)
    kh2, kt2, kr2 = jax.random.split(k_h, 3)
    h2 = make_idx(kh2, (3,), n_ent)
    t2 = make_idx(kt2, (3,), n_ent)
    r2 = make_idx(kr2, (3,), n_rel)
    checks.append((jax.block_until_ready(m2.forward(h2, t2, r2)),
                   _reference_forward(m2, h2, t2, r2), h2.shape))

    # 3) multi-tile path: n = 2*173 = 346 with a 128-row tile cap -> 3 tiles,
    #    divisor-aware padding (384 total), p=1.
    kh3, kt3, kr3 = jax.random.split(k_t, 3)
    h3 = make_idx(kh3, (2, 173), n_ent)
    t3 = make_idx(kt3, (2, 173), n_ent)
    r3 = make_idx(kr3, (2, 173), n_rel)
    checks.append((jax.block_until_ready(m1.forward(h3, t3, r3, max_rows_per_tile=128)),
                   _reference_forward(m1, h3, t3, r3), h3.shape))

    # The hi/lo split keeps the MXU row-sum at ~f32 accuracy, so tolerances are
    # tight again (differences are only rsqrt-vs-div and summation order).
    for out, ref, shp in checks:
        assert out.shape == shp, (out.shape, shp)
        err = float(jnp.max(jnp.abs(out - ref)))
        assert jnp.allclose(out, ref, atol=2e-4, rtol=2e-4), err

    print("KERNEL_OK")
</pallas_src>

<mosaic_0001>
module attributes {stable_mosaic.version = 11 : i64} {
  func.func @_transd_kernel(%arg0: i32, %arg1: memref<8xi32, #tpu.memory_space<smem>>, %arg2: memref<8xi32, #tpu.memory_space<smem>>, %arg3: memref<8xi32, #tpu.memory_space<smem>>, %arg4: memref<32x64xf32, #tpu.memory_space<any>>, %arg5: memref<8x64xf32, #tpu.memory_space<any>>, %arg6: memref<1x8xf32, #tpu.memory_space<vmem>>, %arg7: memref<8x64xf32, #tpu.memory_space<vmem>>, %arg8: memref<8x64xf32, #tpu.memory_space<vmem>>, %arg9: memref<8x64xf32, #tpu.memory_space<vmem>>, %arg10: memref<3x!tpu.dma_semaphore, #tpu.memory_space<semaphore_mem>>) attributes {dimension_semantics = [#tpu.dimension_semantics<parallel>], iteration_bounds = array<i64: 1>, scalar_prefetch = 3 : i64, scratch_operands = 4 : i64, tpu.core_type = #tpu.core_type<tc>, window_params = [{}, {}, {transform_indices = @transform_2, window_bounds = array<i64: 1, 8>}]} {
    %c8_i32 = arith.constant 8 : i32
    %0 = arith.muli %arg0, %c8_i32 : i32
    %c0_i32 = arith.constant 0 : i32
    %c8_i32_0 = arith.constant 8 : i32
    %1 = arith.addi %c0_i32, %c8_i32_0 : i32
    %c1_i32 = arith.constant 1 : i32
    scf.for %arg11 = %c0_i32 to %1 step %c1_i32  : i32 {
      %c1_i32_26 = arith.constant 1 : i32
      %75 = arith.muli %arg11, %c1_i32_26 : i32
      %c0_i32_27 = arith.constant 0 : i32
      %76 = arith.addi %c0_i32_27, %75 : i32
      %77 = arith.addi %0, %76 : i32
      %78 = arith.index_cast %77 : i32 to index
      %79 = memref.load %arg1[%78] : memref<8xi32, #tpu.memory_space<smem>>
      %c0_i32_28 = arith.constant 0 : i32
      %c0_i32_29 = arith.constant 0 : i32
      %80 = tpu.memref_slice %arg4[%79, %c0_i32_29] : memref<32x64xf32, #tpu.memory_space<any>> -> memref<1x64xf32, #tpu.memory_space<any>>
      %c0_i32_30 = arith.constant 0 : i32
      %81 = tpu.memref_slice %arg7[%76, %c0_i32_30] : memref<8x64xf32, #tpu.memory_space<vmem>> -> memref<1x64xf32, #tpu.memory_space<vmem>>
      %82 = tpu.memref_slice %arg10[%c0_i32_28] : memref<3x!tpu.dma_semaphore, #tpu.memory_space<semaphore_mem>> -> memref<1x!tpu.dma_semaphore, #tpu.memory_space<semaphore_mem>>
      %83 = tpu.memref_squeeze %82 : memref<1x!tpu.dma_semaphore, #tpu.memory_space<semaphore_mem>> -> memref<!tpu.dma_semaphore, #tpu.memory_space<semaphore_mem>>
      tpu.enqueue_dma source(%80 : memref<1x64xf32, #tpu.memory_space<any>>) target(%81 : memref<1x64xf32, #tpu.memory_space<vmem>>) target_semaphore(%83 : memref<!tpu.dma_semaphore, #tpu.memory_space<semaphore_mem>>)
      %84 = arith.addi %0, %76 : i32
      %85 = arith.index_cast %84 : i32 to index
      %86 = memref.load %arg2[%85] : memref<8xi32, #tpu.memory_space<smem>>
      %c1_i32_31 = arith.constant 1 : i32
      %c0_i32_32 = arith.constant 0 : i32
      %87 = tpu.memref_slice %arg4[%86, %c0_i32_32] : memref<32x64xf32, #tpu.memory_space<any>> -> memref<1x64xf32, #tpu.memory_space<any>>
      %c0_i32_33 = arith.constant 0 : i32
      %88 = tpu.memref_slice %arg8[%76, %c0_i32_33] : memref<8x64xf32, #tpu.memory_space<vmem>> -> memref<1x64xf32, #tpu.memory_space<vmem>>
      %89 = tpu.memref_slice %arg10[%c1_i32_31] : memref<3x!tpu.dma_semaphore, #tpu.memory_space<semaphore_mem>> -> memref<1x!tpu.dma_semaphore, #tpu.memory_space<semaphore_mem>>
      %90 = tpu.memref_squeeze %89 : memref<1x!tpu.dma_semaphore, #tpu.memory_space<semaphore_mem>> -> memref<!tpu.dma_semaphore, #tpu.memory_space<semaphore_mem>>
      tpu.enqueue_dma source(%87 : memref<1x64xf32, #tpu.memory_space<any>>) target(%88 : memref<1x64xf32, #tpu.memory_space<vmem>>) target_semaphore(%90 : memref<!tpu.dma_semaphore, #tpu.memory_space<semaphore_mem>>)
      %91 = arith.addi %0, %76 : i32
      %92 = arith.index_cast %91 : i32 to index
      %93 = memref.load %arg3[%92] : memref<8xi32, #tpu.memory_space<smem>>
      %c2_i32 = arith.constant 2 : i32
      %c0_i32_34 = arith.constant 0 : i32
      %94 = tpu.memref_slice %arg5[%93, %c0_i32_34] : memref<8x64xf32, #tpu.memory_space<any>> -> memref<1x64xf32, #tpu.memory_space<any>>
      %c0_i32_35 = arith.constant 0 : i32
      %95 = tpu.memref_slice %arg9[%76, %c0_i32_35] : memref<8x64xf32, #tpu.memory_space<vmem>> -> memref<1x64xf32, #tpu.memory_space<vmem>>
      %96 = tpu.memref_slice %arg10[%c2_i32] : memref<3x!tpu.dma_semaphore, #tpu.memory_space<semaphore_mem>> -> memref<1x!tpu.dma_semaphore, #tpu.memory_space<semaphore_mem>>
      %97 = tpu.memref_squeeze %96 : memref<1x!tpu.dma_semaphore, #tpu.memory_space<semaphore_mem>> -> memref<!tpu.dma_semaphore, #tpu.memory_space<semaphore_mem>>
      tpu.enqueue_dma source(%94 : memref<1x64xf32, #tpu.memory_space<any>>) target(%95 : memref<1x64xf32, #tpu.memory_space<vmem>>) target_semaphore(%97 : memref<!tpu.dma_semaphore, #tpu.memory_space<semaphore_mem>>)
    }
    %c8_i32_1 = arith.constant 8 : i32
    %c0_i32_2 = arith.constant 0 : i32
    %c8_i32_3 = arith.constant 8 : i32
    %2 = arith.addi %c0_i32_2, %c8_i32_3 : i32
    %c1_i32_4 = arith.constant 1 : i32
    scf.for %arg11 = %c0_i32_2 to %2 step %c1_i32_4  : i32 {
      %c0_i32_26 = arith.constant 0 : i32
      %c0_i32_27 = arith.constant 0 : i32
      %c0_i32_28 = arith.constant 0 : i32
      %75 = tpu.memref_slice %arg4[%c0_i32_27, %c0_i32_28] : memref<32x64xf32, #tpu.memory_space<any>> -> memref<1x64xf32, #tpu.memory_space<any>>
      %c0_i32_29 = arith.constant 0 : i32
      %c0_i32_30 = arith.constant 0 : i32
      %76 = tpu.memref_slice %arg7[%c0_i32_29, %c0_i32_30] : memref<8x64xf32, #tpu.memory_space<vmem>> -> memref<1x64xf32, #tpu.memory_space<vmem>>
      %77 = tpu.memref_slice %arg10[%c0_i32_26] : memref<3x!tpu.dma_semaphore, #tpu.memory_space<semaphore_mem>> -> memref<1x!tpu.dma_semaphore, #tpu.memory_space<semaphore_mem>>
      %78 = tpu.memref_squeeze %77 : memref<1x!tpu.dma_semaphore, #tpu.memory_space<semaphore_mem>> -> memref<!tpu.dma_semaphore, #tpu.memory_space<semaphore_mem>>
      tpu.wait_dma2 semaphore(%78 : memref<!tpu.dma_semaphore, #tpu.memory_space<semaphore_mem>>) src(%75 : memref<1x64xf32, #tpu.memory_space<any>>) dst(%76 : memref<1x64xf32, #tpu.memory_space<vmem>>)
      %c1_i32_31 = arith.constant 1 : i32
      %c0_i32_32 = arith.constant 0 : i32
      %c0_i32_33 = arith.constant 0 : i32
      %79 = tpu.memref_slice %arg4[%c0_i32_32, %c0_i32_33] : memref<32x64xf32, #tpu.memory_space<any>> -> memref<1x64xf32, #tpu.memory_space<any>>
      %c0_i32_34 = arith.constant 0 : i32
      %c0_i32_35 = arith.constant 0 : i32
      %80 = tpu.memref_slice %arg8[%c0_i32_34, %c0_i32_35] : memref<8x64xf32, #tpu.memory_space<vmem>> -> memref<1x64xf32, #tpu.memory_space<vmem>>
      %81 = tpu.memref_slice %arg10[%c1_i32_31] : memref<3x!tpu.dma_semaphore, #tpu.memory_space<semaphore_mem>> -> memref<1x!tpu.dma_semaphore, #tpu.memory_space<semaphore_mem>>
      %82 = tpu.memref_squeeze %81 : memref<1x!tpu.dma_semaphore, #tpu.memory_space<semaphore_mem>> -> memref<!tpu.dma_semaphore, #tpu.memory_space<semaphore_mem>>
      tpu.wait_dma2 semaphore(%82 : memref<!tpu.dma_semaphore, #tpu.memory_space<semaphore_mem>>) src(%79 : memref<1x64xf32, #tpu.memory_space<any>>) dst(%80 : memref<1x64xf32, #tpu.memory_space<vmem>>)
      %c2_i32 = arith.constant 2 : i32
      %c0_i32_36 = arith.constant 0 : i32
      %c0_i32_37 = arith.constant 0 : i32
      %83 = tpu.memref_slice %arg5[%c0_i32_36, %c0_i32_37] : memref<8x64xf32, #tpu.memory_space<any>> -> memref<1x64xf32, #tpu.memory_space<any>>
      %c0_i32_38 = arith.constant 0 : i32
      %c0_i32_39 = arith.constant 0 : i32
      %84 = tpu.memref_slice %arg9[%c0_i32_38, %c0_i32_39] : memref<8x64xf32, #tpu.memory_space<vmem>> -> memref<1x64xf32, #tpu.memory_space<vmem>>
      %85 = tpu.memref_slice %arg10[%c2_i32] : memref<3x!tpu.dma_semaphore, #tpu.memory_space<semaphore_mem>> -> memref<1x!tpu.dma_semaphore, #tpu.memory_space<semaphore_mem>>
      %86 = tpu.memref_squeeze %85 : memref<1x!tpu.dma_semaphore, #tpu.memory_space<semaphore_mem>> -> memref<!tpu.dma_semaphore, #tpu.memory_space<semaphore_mem>>
      tpu.wait_dma2 semaphore(%86 : memref<!tpu.dma_semaphore, #tpu.memory_space<semaphore_mem>>) src(%83 : memref<1x64xf32, #tpu.memory_space<any>>) dst(%84 : memref<1x64xf32, #tpu.memory_space<vmem>>)
    }
    %c0 = arith.constant 0 : index
    %c0_5 = arith.constant 0 : index
    %3 = vector.load %arg7[%c0, %c0_5] : memref<8x64xf32, #tpu.memory_space<vmem>>, vector<8x64xf32>
    %c0_6 = arith.constant 0 : index
    %c0_7 = arith.constant 0 : index
    %4 = vector.load %arg8[%c0_6, %c0_7] : memref<8x64xf32, #tpu.memory_space<vmem>>, vector<8x64xf32>
    %c0_8 = arith.constant 0 : index
    %c0_9 = arith.constant 0 : index
    %5 = vector.load %arg9[%c0_8, %c0_9] : memref<8x64xf32, #tpu.memory_space<vmem>>, vector<8x64xf32>
    %6 = vector.extract_strided_slice %3 {offsets = [0, 0], sizes = [8, 32], strides = [1, 1]} : vector<8x64xf32> to vector<8x32xf32>
    %7 = arith.mulf %6, %6 : vector<8x32xf32>
    %cst = arith.constant dense<0.000000e+00> : vector<8xf32>
    %8 = vector.multi_reduction <add>, %7, %cst [1] : vector<8x32xf32> to vector<8xf32>
    %9 = vector.shape_cast %8 : vector<8xf32> to vector<8x1xf32>
    %cst_10 = arith.constant 1.000000e-24 : f32
    %10 = vector.broadcast %cst_10 : f32 to vector<8x1xf32>
    %11 = arith.maximumf %9, %10 : vector<8x1xf32>
    %12 = math.rsqrt %11 : vector<8x1xf32>
    %13 = vector.broadcast %12 : vector<8x1xf32> to vector<8x32xf32>
    %14 = arith.mulf %6, %13 : vector<8x32xf32>
    %15 = vector.extract_strided_slice %3 {offsets = [0, 32], sizes = [8, 32], strides = [1, 1]} : vector<8x64xf32> to vector<8x32xf32>
    %16 = vector.extract_strided_slice %4 {offsets = [0, 0], sizes = [8, 32], strides = [1, 1]} : vector<8x64xf32> to vector<8x32xf32>
    %17 = arith.mulf %16, %16 : vector<8x32xf32>
    %cst_11 = arith.constant dense<0.000000e+00> : vector<8xf32>
    %18 = vector.multi_reduction <add>, %17, %cst_11 [1] : vector<8x32xf32> to vector<8xf32>
    %19 = vector.shape_cast %18 : vector<8xf32> to vector<8x1xf32>
    %cst_12 = arith.constant 1.000000e-24 : f32
    %20 = vector.broadcast %cst_12 : f32 to vector<8x1xf32>
    %21 = arith.maximumf %19, %20 : vector<8x1xf32>
    %22 = math.rsqrt %21 : vector<8x1xf32>
    %23 = vector.broadcast %22 : vector<8x1xf32> to vector<8x32xf32>
    %24 = arith.mulf %16, %23 : vector<8x32xf32>
    %25 = vector.extract_strided_slice %4 {offsets = [0, 32], sizes = [8, 32], strides = [1, 1]} : vector<8x64xf32> to vector<8x32xf32>
    %26 = vector.extract_strided_slice %5 {offsets = [0, 0], sizes = [8, 32], strides = [1, 1]} : vector<8x64xf32> to vector<8x32xf32>
    %27 = arith.mulf %26, %26 : vector<8x32xf32>
    %cst_13 = arith.constant dense<0.000000e+00> : vector<8xf32>
    %28 = vector.multi_reduction <add>, %27, %cst_13 [1] : vector<8x32xf32> to vector<8xf32>
    %29 = vector.shape_cast %28 : vector<8xf32> to vector<8x1xf32>
    %cst_14 = arith.constant 1.000000e-24 : f32
    %30 = vector.broadcast %cst_14 : f32 to vector<8x1xf32>
    %31 = arith.maximumf %29, %30 : vector<8x1xf32>
    %32 = math.rsqrt %31 : vector<8x1xf32>
    %33 = vector.broadcast %32 : vector<8x1xf32> to vector<8x32xf32>
    %34 = arith.mulf %26, %33 : vector<8x32xf32>
    %35 = vector.extract_strided_slice %5 {offsets = [0, 32], sizes = [8, 32], strides = [1, 1]} : vector<8x64xf32> to vector<8x32xf32>
    %36 = arith.mulf %14, %15 : vector<8x32xf32>
    %cst_15 = arith.constant dense<0.000000e+00> : vector<8xf32>
    %37 = vector.multi_reduction <add>, %36, %cst_15 [1] : vector<8x32xf32> to vector<8xf32>
    %38 = vector.shape_cast %37 : vector<8xf32> to vector<8x1xf32>
    %39 = vector.broadcast %38 : vector<8x1xf32> to vector<8x32xf32>
    %40 = arith.mulf %39, %35 : vector<8x32xf32>
    %41 = arith.addf %14, %40 : vector<8x32xf32>
    %42 = arith.mulf %41, %41 : vector<8x32xf32>
    %cst_16 = arith.constant dense<0.000000e+00> : vector<8xf32>
    %43 = vector.multi_reduction <add>, %42, %cst_16 [1] : vector<8x32xf32> to vector<8xf32>
    %44 = vector.shape_cast %43 : vector<8xf32> to vector<8x1xf32>
    %cst_17 = arith.constant 1.000000e-24 : f32
    %45 = vector.broadcast %cst_17 : f32 to vector<8x1xf32>
    %46 = arith.maximumf %44, %45 : vector<8x1xf32>
    %47 = math.rsqrt %46 : vector<8x1xf32>
    %48 = vector.broadcast %47 : vector<8x1xf32> to vector<8x32xf32>
    %49 = arith.mulf %41, %48 : vector<8x32xf32>
    %50 = arith.mulf %24, %25 : vector<8x32xf32>
    %cst_18 = arith.constant dense<0.000000e+00> : vector<8xf32>
    %51 = vector.multi_reduction <add>, %50, %cst_18 [1] : vector<8x32xf32> to vector<8xf32>
    %52 = vector.shape_cast %51 : vector<8xf32> to vector<8x1xf32>
    %53 = vector.broadcast %52 : vector<8x1xf32> to vector<8x32xf32>
    %54 = arith.mulf %53, %35 : vector<8x32xf32>
    %55 = arith.addf %24, %54 : vector<8x32xf32>
    %56 = arith.mulf %55, %55 : vector<8x32xf32>
    %cst_19 = arith.constant dense<0.000000e+00> : vector<8xf32>
    %57 = vector.multi_reduction <add>, %56, %cst_19 [1] : vector<8x32xf32> to vector<8xf32>
    %58 = vector.shape_cast %57 : vector<8xf32> to vector<8x1xf32>
    %cst_20 = arith.constant 1.000000e-24 : f32
    %59 = vector.broadcast %cst_20 : f32 to vector<8x1xf32>
    %60 = arith.maximumf %58, %59 : vector<8x1xf32>
    %61 = math.rsqrt %60 : vector<8x1xf32>
    %62 = vector.broadcast %61 : vector<8x1xf32> to vector<8x32xf32>
    %63 = arith.mulf %55, %62 : vector<8x32xf32>
    %64 = arith.subf %63, %49 : vector<8x32xf32>
    %65 = arith.subf %64, %34 : vector<8x32xf32>
    %cst_21 = arith.constant 1.000000e+00 : f32
    %66 = vector.broadcast %cst_21 : f32 to vector<1x32xf32>
    %67 = math.absf %65 : vector<8x32xf32>
    %68 = arith.truncf %67 : vector<8x32xf32> to vector<8x32xbf16>
    %69 = arith.extf %68 : vector<8x32xbf16> to vector<8x32xf32>
    %70 = arith.subf %67, %69 : vector<8x32xf32>
    %cst_22 = arith.constant dense<0.000000e+00> : vector<1x8xf32>
    %71 = tpu.matmul %66, %69, %cst_22 {dimension_numbers = #tpu.dot_dimension_numbers<[1], [1], [0], [0], [0, 0, 1, 0], [], []>} : vector<1x32xf32>, vector<8x32xf32>, vector<1x8xf32> -> vector<1x8xf32>
    %cst_23 = arith.constant dense<0.000000e+00> : vector<1x8xf32>
    %72 = tpu.matmul %66, %70, %cst_23 {dimension_numbers = #tpu.dot_dimension_numbers<[1], [1], [0], [0], [0, 0, 1, 0], [], []>} : vector<1x32xf32>, vector<8x32xf32>, vector<1x8xf32> -> vector<1x8xf32>
    %73 = arith.addf %71, %72 : vector<1x8xf32>
    %c0_24 = arith.constant 0 : index
    %c0_25 = arith.constant 0 : index
    %74 = vector.load %arg6[%c0_24, %c0_25] : memref<1x8xf32, #tpu.memory_space<vmem>>, vector<1x8xf32>
    tpu.vector_store %arg6[%c0_24, %c0_25], %73 {strides = array<i32>} : memref<1x8xf32, #tpu.memory_space<vmem>>, vector<1x8xf32>,
    return
  }
  func.func @transform_2(%arg0: i32, %arg1: memref<8xi32, #tpu.memory_space<smem>>, %arg2: memref<8xi32, #tpu.memory_space<smem>>, %arg3: memref<8xi32, #tpu.memory_space<smem>>) -> (i32, i32) {
    %c0_i32 = arith.constant 0 : i32
    %c0_i32_0 = arith.constant 0 : i32
    return %c0_i32, %arg0 : i32, i32
  }
}

</mosaic_0001>

<bundles_post_ra>
// kernel: tpu_custom_call.1
= control target key start
LH: loop header
LB: loop body
LE: loop exit
PB: predicated region body
PF: predicated region fallthrough
CT: control target
= control target key end

     0   :  { %s728_s0 = inlined_call_operand.hbm [shape: s32[8], index: 0, kind: input, shape index: {}]   ;;  %s729_s3 = inlined_call_operand.hbm [shape: f32[32,64], index: 3, kind: input, shape index: {}]   ;;  %s730_s4 = inlined_call_operand.vmem [shape: f32[8,64], index: 4, kind: input, shape index: {}]   ;;  %s731_s5 = inlined_call_operand.hbm [shape: f32[1,8], index: 5, kind: output, shape index: {}]   ;;  %s732_s1 = inlined_call_operand.vmem [shape: s32[8], index: 1, kind: input, shape index: {}]   ;;  %s733_s2 = inlined_call_operand.vmem [shape: s32[8], index: 2, kind: input, shape index: {}]  }
   0x1   :  { %s469_s20 = scalar_lea.hbm %s728_s0, 16 }
   0x2   :  { %p470_p0 = scmp.ne.s32.totalorder %s728_s0, %s469_s20  ;;  %p473_p1 = scmp.lt.u32.totalorder %s469_s20, %s728_s0 }
   0x4   :  { %p475_p2 = pnand %p473_p1, %p470_p0 }
   0x6   :  { %478 = shalt.err (!%p475_p2)  }
   0x7   :  { %s599_s25 = smov [#allocation7]   ;;  %s12_s30 = sshll.u32 %s732_s1, 4  ;;  %s13_s30 = int_to_ptr.vmem [resolvable:$true] %s12_s30 }
   0x8   :  { %11 = dma.hbm_to_smem %s728_s0, 16, %s599_s25, [#allocation6] }
   0x9   :  { %s16_s8 = sshll.u32 %s733_s2, 4  ;;  %s479_s9 = scalar_lea.vmem %s13_s30, 16  ;;  %s17_s8 = int_to_ptr.vmem [resolvable:$true] %s16_s8 }
   0xa   :  { %p480_p3 = scmp.ne.s32.totalorder %s13_s30, %s479_s9  ;;  %p484_p4 = scmp.lt.s32.totalorder %s13_s30, %s13_s30 }
   0xb   :  { %p485_p5 = scmp.lt.s32.totalorder %s479_s9, %s479_s9 }
   0xd   :  { %p486_p6 = por %p485_p5, %p484_p4 }
   0xf   :  { %p487_p7 = pnand %p486_p6, %p480_p3 }
  0x11   :  { %490 = shalt.err (!%p487_p7)  }
  0x12   :  { %s600_s10 = smov [#allocation8]   ;;  %s491_s0 = scalar_lea.vmem %s17_s8, 16 }
  0x13   :  { %15 = dma.vmem_to_smem %s13_s30, 16, %s600_s10, [#allocation6] }
  0x14   :  { %p492_p8 = scmp.ne.s32.totalorder %s17_s8, %s491_s0  ;;  %p496_p9 = scmp.lt.s32.totalorder %s17_s8, %s17_s8 }
  0x15   :  { %p497_p10 = scmp.lt.s32.totalorder %s491_s0, %s491_s0 }
  0x17   :  { %p498_p11 = por %p497_p10, %p496_p9 }
  0x19   :  { %p499_p12 = pnand %p498_p11, %p492_p8 }
  0x1b   :  { %502 = shalt.err (!%p499_p12)  }
  0x1c   :  { %s601_s1 = smov [#allocation9]  }
  0x1d   :  { %19 = dma.vmem_to_smem %s17_s8, 16, %s601_s1, [#allocation6] }
  0x1e   :  { %581 = dma.done.wait [#allocation6], 48 }
  0x1f   :  { %582 = vsyncadd [#allocation6], 4294967248 }
  0x20   :  { %21 = sfence }
  0x21   :  { %22 = vsyncpa [#allocation11], 0  ;;  %s657_s2 = smov 0  }
  0x22 LB: > { %s31_s11 = sld [smem:[#allocation7 + %s593_s2]]  ;;  %s34_s13 = scalar_lea.vmem [#allocation2], %s593_s2  ;;  %s593_s2 = sphi %s657_s2, %s29_s2  }
  0x23   : > { %s664_s12 = sld [smem:[#allocation8 + %s593_s2]]  ;;  %s42_s14 = sshll.u32 %s34_s13, 4  ;;  %s43_s14 = int_to_ptr.vmem [resolvable:$true] %s42_s14 }
  0x24   : > { %s49_s15 = scalar_lea.vmem [#allocation3], %s593_s2  ;;  %s669_s17 = sld [smem:[#allocation9 + %s593_s2]] }
  0x25   : > { %s58_s16 = sshll.u32 %s49_s15, 4  ;;  %s505_s26 = scalar_lea.hbm %s729_s3, 512  ;;  %s671_s16 = int_to_ptr.vmem [resolvable:$true] %s58_s16 }
  0x28   : > { %s411_s18 = sshll.u32 %s31_s11, 4 }
  0x29   : > { %s33_s21 = scalar_lea.hbm %s729_s3, %s411_s18  ;;  %s412_s22 = sshll.u32 %s664_s12, 4 }
  0x2a   : > { %s503_s23 = scalar_lea.hbm %s33_s21, 16  ;;  %p506_p0 = scmp.lt.u32.totalorder %s33_s21, %s729_s3 }
  0x2b   : > { %p504_p13 = scmp.ne.s32.totalorder %s33_s21, %s503_s23  ;;  %p507_p1 = scmp.lt.u32.totalorder %s505_s26, %s503_s23 }
  0x2c   : > { %p509_p3 = scmp.lt.u32.totalorder %s503_s23, %s33_s21 }
  0x2d   : > { %p508_p2 = por %p507_p1, %p506_p0 }
  0x2f   : > { %p510_p4 = por %p509_p3, %p508_p2 }
  0x31   : > { %p511_p5 = pnand %p510_p4, %p504_p13 }
  0x33   : > { %514 = shalt.err (!%p511_p5)  }
  0x34   : > { %s515_s29 = scalar_lea.vmem %s43_s14, 16  ;;  %s602_s30 = smov [#allocation2]  }
  0x35   : > { %p516_p6 = scmp.ne.s32.totalorder %s43_s14, %s515_s29  ;;  %s517_s6 = sshll.u32 %s602_s30, 4  ;;  %s518_s6 = int_to_ptr.vmem [resolvable:$false] %s517_s6 }
  0x36   : > { %s519_s7 = scalar_lea.vmem %s518_s6, 128  ;;  %p520_p7 = scmp.lt.s32.totalorder %s43_s14, %s518_s6 }
  0x37   : > { %p521_p8 = scmp.lt.s32.totalorder %s519_s7, %s515_s29 }
  0x39   : > { %p522_p9 = por %p521_p8, %p520_p7 }
  0x3b   : > { %p523_p10 = pnand %p522_p9, %p516_p6 }
  0x3d   : > { %526 = shalt.err (!%p523_p10)  }
  0x3e   : > { %45 = dma.hbm_to_vmem [thread:$0]  %s33_s21, 16, %s43_s14, [#allocation5] }
  0x3f   : > { %s48_s10 = scalar_lea.hbm %s729_s3, %s412_s22  ;;  %s63_s11 = scalar_lea.vmem %s730_s4, %s669_s17 }
  0x40   : > { %s527_s12 = scalar_lea.hbm %s48_s10, 16  ;;  %p530_p12 = scmp.lt.u32.totalorder %s48_s10, %s729_s3 }
  0x41   : > { %p528_p11 = scmp.ne.s32.totalorder %s48_s10, %s527_s12  ;;  %p531_p13 = scmp.lt.u32.totalorder %s505_s26, %s527_s12 }
  0x42   : > { %p533_p1 = scmp.lt.u32.totalorder %s527_s12, %s48_s10 }
  0x43   : > { %p532_p0 = por %p531_p13, %p530_p12 }
  0x45   : > { %p534_p2 = por %p533_p1, %p532_p0 }
  0x47   : > { %p535_p3 = pnand %p534_p2, %p528_p11 }
  0x49   : > { %538 = shalt.err (!%p535_p3)  }
  0x4a   : > { %s539_s14 = scalar_lea.vmem %s671_s16, 16  ;;  %s603_s18 = smov [#allocation3]  }
  0x4b   : > { %p540_p4 = scmp.ne.s32.totalorder %s671_s16, %s539_s14  ;;  %s541_s19 = sshll.u32 %s603_s18, 4  ;;  %s542_s19 = int_to_ptr.vmem [resolvable:$false] %s541_s19 }
  0x4c   : > { %s543_s17 = scalar_lea.vmem %s542_s19, 128  ;;  %p544_p5 = scmp.lt.s32.totalorder %s671_s16, %s542_s19 }
  0x4d   : > { %p545_p6 = scmp.lt.s32.totalorder %s543_s17, %s539_s14 }
  0x4f   : > { %p546_p7 = por %p545_p6, %p544_p5 }
  0x51   : > { %p547_p8 = pnand %p546_p7, %p540_p4 }
  0x53   : > { %550 = shalt.err (!%p547_p8)  }
  0x54   : > { %61 = dma.hbm_to_vmem [thread:$0]  %s48_s10, 16, %s671_s16, [#allocation5 + $0x1]  ;;  %v83_v0 = vld [vmem:[%s63_s11] sm:$0x1] }
  0x55   : > { %s64_s20 = scalar_lea.vmem [#allocation4], %s593_s2 }
  0x56   : > { %84 = vst [vmem:[%s64_s20] sm:$0x1] %v83_v0 }
  0x57   : > { %109 = vsyncadd [#allocation5 + $0x2], 16  ;;  %s29_s2 = sadd.s32 1, %s593_s2  }
  0x58   : > { %p26_p9 = scmp.ge.s32.totalorder %s29_s2, 8  }
  0x59   :  { %s595_s21 = smov (%p26_p9), 0  }
  0x5a   :  { %28 = sbr.rel (!%p26_p9) target bundleno = 34 (0x22), region = 94 }
  0x61 LB: > { %583 = dma.done.wait [#allocation5], 16  ;;  %s597_s21 = sphi %s595_s21, %s115_s21  }
  0x62   : > { %584 = vsyncadd [#allocation5], 4294967280 }
  0x63   : > { %585 = dma.done.wait [#allocation5 + $0x1], 16 }
  0x64   : > { %586 = vsyncadd [#allocation5 + $0x1], 4294967280 }
  0x65   : > { %587 = dma.done.wait [#allocation5 + $0x2], 16 }
  0x66   : > { %588 = vsyncadd [#allocation5 + $0x2], 4294967280  ;;  %s115_s21 = sadd.s32 1, %s597_s21  }
  0x67   : > { %p112_p10 = scmp.ge.s32.totalorder %s115_s21, 8  }
  0x68   :  { %v125_v1 = vld [vmem:[#allocation2] sm:$0xff] (%p112_p10)  ;;  %vm129_vm0 = vcmask (%p112_p10), 261120   ;;  %v126_v2 = vld [vmem:[#allocation3] sm:$0xff] (%p112_p10)  ;;  %s604_s2 = smov (%p112_p10), 96   ;;  %v127_v21 = vld [vmem:[#allocation4] sm:$0xff] (%p112_p10)  ;;  %v605_v36 = vmov (%p112_p10), 0.0  }
  0x69   :  { %114 = sbr.rel (!%p112_p10) target bundleno = 97 (0x61), region = 105  ;;  %v128_v3 = vmul.f32 (%p112_p10), %v125_v1, %v125_v1  ;;  %v136_v4 = vmul.f32 (%p112_p10), %v126_v2, %v126_v2  ;;  %151 = vrot.lane.b32.xlu1 (%p112_p10), %v125_v1, %s604_s2  ;;  %v143_v33 = vmul.f32 (%p112_p10), %v127_v21, %v127_v21  ;;  %429 = vmatprep.subr.mxu0 (%p112_p10), %v605_v36  ;;  %vm606_vm1 = vmmov (%p112_p10), 0   ;;  %s608_s3 = smov (%p112_p10), [#allocation10]  }
  0x6a   :  { %424 = vmatprep.subr.mxu1 (%p112_p10), %v605_v36  ;;  %431 = vmatprep.mubr.msk.f32.mxu0 (%p112_p10), %vm606_vm1, %v605_v36  ;;  %v607_v55 = vmov (%p112_p10), 1.0   ;;  %s355_s4 = sshll.u32 (%p112_p10), %s608_s3, 4  ;;  %vm347_vm2 = vcmask (%p112_p10), 57344   ;;  %s356_s4 = int_to_ptr.vmem [resolvable:$true] %s355_s4 }
  0x6b   :  { %v130_v5 = vsel (%p112_p10), %vm129_vm0, %v128_v3, 0.0  ;;  %v137_v6 = vsel (%p112_p10), %vm129_vm0, %v136_v4, 0.0  ;;  %v144_v35 = vsel (%p112_p10), %vm129_vm0, %v143_v33, 0.0  ;;  %426 = vmatprep.mubr.msk.f32.mxu1 (%p112_p10), %vm606_vm1, %v605_v36  ;;  %s551_s16 = scalar_lea.vmem (%p112_p10), %s356_s4, 16  ;;  %s555_s22 = scalar_lea.vmem (%p112_p10), %s356_s4, 32 }
  0x6c   :  { %131 = vadd.xlane.f32.xlu0 (%p112_p10), %v130_v5  ;;  %p552_p11 = scmp.ne.s32.totalorder (%p112_p10), %s356_s4, %s551_s16  ;;  %p556_p12 = scmp.lt.s32.totalorder (%p112_p10), %s356_s4, %s356_s4 }
  0x6d   :  { %172 = vrot.lane.b32.xlu1 (%p112_p10), %v126_v2, %s604_s2  ;;  %p557_p13 = scmp.lt.s32.totalorder (%p112_p10), %s555_s22, %s551_s16 }
  0x6f   :  { %p558_p0 = por (%p112_p10), %p557_p13, %p556_p12 }
  0x70   :  { %138 = vadd.xlane.f32.xlu0 %v137_v6 }
  0x71   :  { %p559_p1 = pnand %p558_p0, %p552_p11 }
  0xdb   :  { %v152_v11 = vpop.permute.xlu1 %151 }
  0xdf   :  { %v173_v16 = vpop.permute.xlu1 %172 }
  0xf9   :  { %v132_v7 = vpop.xlane.xlu0 %131 }
  0xfa   :  { %v133_v8 = vmax.f32 %v132_v7, 1e-24 }
  0xfc   :  { %459 = vrsqrt.f32 %v133_v8 }
  0xfd   :  { %v139_v9 = vpop.xlane.xlu0 %138 }
  0xfe   :  { %v140_v10 = vmax.f32 %v139_v9, 1e-24 }
 0x100   :  { %461 = vrsqrt.f32 %v140_v10 }
 0x106   :  { %v460_v12 = vpop.eup %459 }
 0x107   :  { %v135_v13 = vmul.f32 %v460_v12, %v125_v1 }
 0x109   :  { %v154_v14 = vmul.f32 %v152_v11, %v135_v13 }
 0x10a   :  { %v462_v15 = vpop.eup %461 }
 0x10b   :  { %v142_v17 = vmul.f32 %v462_v15, %v126_v2  ;;  %v155_v18 = vsel %vm129_vm0, %v154_v14, 0.0 }
 0x10c   :  { %156 = vadd.xlane.f32.xlu0 %v155_v18 }
 0x10d   :  { %v175_v19 = vmul.f32 %v173_v16, %v142_v17 }
 0x10f   :  { %v176_v20 = vsel %vm129_vm0, %v175_v19, 0.0 }
 0x110   :  { %177 = vadd.xlane.f32.xlu1 %v176_v20 }
 0x199   :  { %v157_v22 = vpop.xlane.xlu0 %156 }
 0x19a   :  { %v158_v23 = vmul.f32 %v157_v22, %v127_v21 }
 0x19c   :  { %160 = vrot.lane.b32.xlu0 %v158_v23, %s604_s2 }
 0x19d   :  { %v178_v24 = vpop.xlane.xlu1 %177 }
 0x19e   :  { %v179_v25 = vmul.f32 %v178_v24, %v127_v21 }
 0x1a0   :  { %181 = vrot.lane.b32.xlu0 %v179_v25, %s604_s2 }
 0x20e   :  { %v161_v26 = vpop.permute.xlu0 %160 }
 0x20f   :  { %v163_v27 = vadd.f32 %v161_v26, %v135_v13 }
 0x211   :  { %v164_v28 = vmul.f32 %v163_v27, %v163_v27 }
 0x212   :  { %v182_v29 = vpop.permute.xlu0 %181 }
 0x213   :  { %v184_v30 = vadd.f32 %v182_v29, %v142_v17  ;;  %v165_v31 = vsel %vm129_vm0, %v164_v28, 0.0 }
 0x214   :  { %166 = vadd.xlane.f32.xlu0 %v165_v31 }
 0x215   :  { %v185_v32 = vmul.f32 %v184_v30, %v184_v30 }
 0x217   :  { %v186_v34 = vsel %vm129_vm0, %v185_v32, 0.0 }
 0x218   :  { %187 = vadd.xlane.f32.xlu1 %v186_v34 }
 0x21c   :  { %145 = vadd.xlane.f32.xlu1 %v144_v35 }
 0x2a1   :  { %v167_v37 = vpop.xlane.xlu0 %166 }
 0x2a2   :  { %v168_v38 = vmax.f32 %v167_v37, 1e-24 }
 0x2a4   :  { %463 = vrsqrt.f32 %v168_v38 }
 0x2a5   :  { %v188_v39 = vpop.xlane.xlu1 %187 }
 0x2a6   :  { %v189_v40 = vmax.f32 %v188_v39, 1e-24 }
 0x2a8   :  { %465 = vrsqrt.f32 %v189_v40 }
 0x2a9   :  { %v146_v41 = vpop.xlane.xlu1 %145 }
 0x2aa   :  { %v147_v42 = vmax.f32 %v146_v41, 1e-24 }
 0x2ac   :  { %467 = vrsqrt.f32 %v147_v42 }
 0x2ae   :  { %v464_v43 = vpop.eup %463 }
 0x2af   :  { %v170_v46 = vmul.f32 %v464_v43, %v163_v27 }
 0x2b2   :  { %v466_v44 = vpop.eup %465 }
 0x2b3   :  { %v191_v45 = vmul.f32 %v466_v44, %v184_v30 }
 0x2b5   :  { %v192_v49 = vsub.f32 %v191_v45, %v170_v46 }
 0x2b6   :  { %v468_v47 = vpop.eup %467 }
 0x2b7   :  { %v149_v48 = vmul.f32 %v468_v47, %v127_v21 }
 0x2b9   :  { %v193_v50 = vsub.f32 %v192_v49, %v149_v48 }
 0x2bb   :  { %v194_v51 = vand.u32 2147483647, %v193_v50 }
 0x2bd   :  { %v195_v52 = vpack.c.bf16 %v194_v51, %v194_v51 }
 0x2bf   :  { %v196_v53 = vunpack.c.l.bf16 %v195_v52 }
 0x2c1   :  { %430 = vmatpush3.xpose.msk.msra.mxu0 %vm129_vm0, %v196_v53  ;;  %v197_v54 = vsub.f32 %v194_v51, %v196_v53 }
 0x2c3   :  { %425 = vmatpush3.xpose.msk.msra.mxu1 %vm129_vm0, %v197_v54 }
 0x2c4   :  { %432 = vmatmul.mubr.msk.f32.vlgmr.msra.gmra.mrb[0].mxu0 %vm129_vm0, %v607_v55 }
 0x2c6   :  { %427 = vmatmul.mubr.msk.f32.vlgmr.msra.gmra.mrb[0].mxu1 %vm129_vm0, %v607_v55 }
 0x397   :  { %v343_v56 = vpop.f32.mrb[0].mxu0 }
 0x398   :  { %v433_v57 = vpop.f32.mrb[1].mxu0 }
 0x399   :  { %v270_v58 = vpop.f32.mrb[0].mxu1 }
 0x39a   :  { %v344_v59 = vadd.f32 %v343_v56, %v270_v58  ;;  %v428_v60 = vpop.f32.mrb[1].mxu1 }
 0x39c   :  { %348 = vst.msk [vmem:[#allocation10] sm:$0x1] %vm347_vm2, %v344_v59 }
 0x39d   :  { %562 = shalt.err (!%p559_p1)
}
 0x39e   :  { %s563_s25 = scalar_lea.hbm %s731_s5, 16 }
 0x39f   :  { %p564_p2 = scmp.ne.s32.totalorder %s731_s5, %s563_s25  ;;  %p567_p3 = scmp.lt.u32.totalorder %s563_s25, %s731_s5 }
 0x3a1   :  { %p569_p4 = pnand %p567_p3, %p564_p2 }
 0x3a3   :  { %572 = shalt.err (!%p569_p4)
}
 0x3a4   :  { %358 = dma.vmem_to_hbm [thread:$0]  %s356_s4, 16, %s731_s5, [#allocation11]  }
 0x3a5   :  { %589 = dma.done.wait [#allocation11], 16  }
 0x3a6   :  { %590 = vsyncadd [#allocation11], 4294967280 }
 0x3a7   :  { %362 = vsyncpa [#allocation11], 1 }
 0x3a8   :  { %363 = vsyncmov [#allocation5] }
 0x3ab   :  { %s364_s7 = vpop.sfrf %363 }
 0x3ac   :  { %p417_p5 = scmp.ne.s32.totalorder %s364_s7, 0 }
 0x3ae   :  { %368 = shalt.err (%p417_p5)  }
 0x3af   :  { %370 = vsyncmov [#allocation5 + $0x1] }
 0x3b2   :  { %s371_s8 = vpop.sfrf %370 }
 0x3b3   :  { %p418_p6 = scmp.ne.s32.totalorder %s371_s8, 0 }
 0x3b5   :  { %375 = shalt.err (%p418_p6)  }
 0x3b6   :  { %377 = vsyncmov [#allocation5 + $0x2] }
 0x3b9   :  { %s378_s9 = vpop.sfrf %377 }
 0x3ba   :  { %p419_p7 = scmp.ne.s32.totalorder %s378_s9, 0 }
 0x3bc   :  { %382 = shalt.err (%p419_p7)  }

</bundles_post_ra>
